<compile_context>
chip_gen: v6e
topology: v6e:2x2x1
jax: 0.10.0
libtpu: 0.0.40
codegen_flags: <defaults>
</compile_context>

<pallas_src>
import functools

import jax
import jax.numpy as jnp
import numpy as np
from jax.experimental import pallas as pl
from jax.experimental.pallas import tpu as pltpu


def _global_avg_pool(x, hw_valid):
    # Sum over the (padded) lane axis with f32 accumulation; padded lanes are
    # zero so they do not perturb the sum. Divide by the true spatial size.
    return jnp.sum(x, axis=-1, dtype=jnp.float32) * (1.0 / hw_valid)   # (Bt, C)


def _apply_gate(x, yc, o_ref):
    # Folded double gate (reference computes x*y*y): one broadcast multiply in
    # the input dtype.
    a = jax.nn.sigmoid(yc)                       # (Bt, C) f32
    g = (a * a).astype(x.dtype)                  # (Bt, C)
    o_ref[...] = x * g[:, :, None]


def eca_kernel_roll(w_ref, x_ref, o_ref, *, hw_valid):
    """Lane-aligned-C path: conv via masked channel rolls on the pooled vector.

    w_ref : SMEM (k,)          conv1d taps
    x_ref : VMEM (Bt, C, HWp)  input slab
    o_ref : VMEM (Bt, C, HWp)  output slab
    """
    x = x_ref[...]                               # single load, input dtype
    bt, c, _ = x.shape
    k = w_ref.shape[0]
    pad = (k - 1) // 2

    y = _global_avg_pool(x, hw_valid)            # (Bt, C), C on lanes

    # Zero-padded k-tap conv along the channel (lane) axis: tap j reads y[ch+off].
    ci = jax.lax.broadcasted_iota(jnp.int32, (bt, c), 1)
    yc = y * w_ref[pad]
    for j in range(k):
        off = j - pad
        if off == 0:
            continue
        shifted = pltpu.roll(y, shift=(-off) % c, axis=1)          # y[ch + off] (wrapped)
        valid = jnp.logical_and(ci >= -off, ci <= (c - 1) - off)   # zero-pad boundaries
        yc = yc + jnp.where(valid, shifted, 0.0) * w_ref[j]

    _apply_gate(x, yc, o_ref)


def eca_kernel_band(m_ref, x_ref, o_ref, *, hw_valid):
    """Small-C path: conv via a tiny resident (C, C) band matrix (built in wrapper).

    m_ref : VMEM (C, C)        band matrix, resident across the grid
    x_ref : VMEM (Bt, C, HWp)  input slab
    o_ref : VMEM (Bt, C, HWp)  output slab
    """
    x = x_ref[...]
    y = _global_avg_pool(x, hw_valid)                              # (Bt, C)
    yc = jnp.dot(y, m_ref[...], preferred_element_type=jnp.float32)
    _apply_gate(x, yc, o_ref)


def _pick_batch_tile(b, c, hwp, itemsize, vmem_budget_bytes, want_min_steps=2):
    # Live VMEM per grid step ~= (input + output) * double-buffering * block bytes.
    per_batch = 4 * c * hwp * itemsize
    bt = max(1, min(b, vmem_budget_bytes // max(per_batch, 1)))
    # Keep at least `want_min_steps` grid steps when possible: the batch-tile
    # axis is "parallel", so v7x's two TensorCores each get work.
    if b >= want_min_steps:
        bt = min(bt, max(1, b // want_min_steps))
    while b % bt:
        bt -= 1
    return bt


def eca_forward(x, conv_weight, *, vmem_budget_bytes=16 * 1024 * 1024):
    """x: (B, C, H, W); conv_weight: (k,) float32. Returns (B, C, H, W)."""
    b, c, h, w = x.shape
    hw = h * w
    hwp = pl.cdiv(hw, 128) * 128                 # lane-dense spatial axis
    k = conv_weight.shape[0]
    pad = (k - 1) // 2

    x2 = x.reshape(b, c, hw)
    if hwp != hw:
        x2 = jnp.pad(x2, ((0, 0), (0, 0), (0, hwp - hw)))

    bt = _pick_batch_tile(b, c, hwp, x.dtype.itemsize, vmem_budget_bytes)

    extra_vmem = 0
    if c % 128 == 0:
        # Large, lane-aligned channel count: roll-based conv, no O(C^2) anything.
        kernel = functools.partial(eca_kernel_roll, hw_valid=float(hw))
        extra_in = conv_weight
        extra_spec = pl.BlockSpec(memory_space=pltpu.MemorySpace.SMEM)
    else:
        # Small / unaligned C: build the (C, C) band ONCE here (plain JAX) and keep
        # it resident across the grid via a constant index_map.
        cp = jnp.arange(c)[:, None]              # source channel c'
        cc = jnp.arange(c)[None, :]              # output channel c
        jidx = cp - cc + pad                     # tap index j = c' - c + pad
        band = jnp.where(
            (jidx >= 0) & (jidx < k),
            conv_weight[jnp.clip(jidx, 0, k - 1)], 0.0).astype(jnp.float32)
        kernel = functools.partial(eca_kernel_band, hw_valid=float(hw))
        extra_in = band
        extra_spec = pl.BlockSpec((c, c), lambda i: (0, 0))
        extra_vmem = 2 * c * c * 4

    # vmem limit sized from the actual block, with headroom, capped for v7x.
    block_bytes = bt * c * hwp * x.dtype.itemsize
    vmem_limit = min(64 * 1024 * 1024,
                     max(32 * 1024 * 1024, 6 * block_bytes + extra_vmem))

    out = pl.pallas_call(
        kernel,
        out_shape=jax.ShapeDtypeStruct((b, c, hwp), x.dtype),
        grid=(b // bt,),
        in_specs=[
            extra_spec,
            pl.BlockSpec((bt, c, hwp), lambda i: (i, 0, 0)),
        ],
        out_specs=pl.BlockSpec((bt, c, hwp), lambda i: (i, 0, 0)),
        compiler_params=pltpu.CompilerParams(
            dimension_semantics=("parallel",),
            vmem_limit_bytes=vmem_limit,
        ),
    )(extra_in, x2)

    if hwp != hw:
        out = out[:, :, :hw]
    return out.reshape(b, c, h, w)


def eca_reference(x, conv_weight):
    """Plain-JAX reference mirroring the PyTorch forward (for correctness check)."""
    k = conv_weight.shape[0]
    pad = (k - 1) // 2
    y = jnp.mean(x, axis=(2, 3))                                   # (B, C)
    yp = jnp.pad(y, ((0, 0), (pad, pad)))
    conv = sum(conv_weight[j] * yp[:, j:j + y.shape[1]] for j in range(k))
    a = jax.nn.sigmoid(conv)[:, :, None, None]                     # (B, C, 1, 1)
    return x * a * a


if __name__ == "__main__":
    key = jax.random.PRNGKey(0)
    kx, kx2, kw = jax.random.split(key, 3)

    k_size = 3
    # PyTorch Conv1d default init: U(-b, b), b = 1/sqrt(fan_in) = 1/sqrt(k).
    bound = 1.0 / np.sqrt(1 * k_size)
    conv_weight = jax.random.uniform(
        kw, (k_size,), dtype=jnp.float32, minval=-bound, maxval=bound)

    # Case 1: module-spec shape (band-matrix conv path), B=2, C=4, 16x16.
    x_small = jax.random.normal(kx, (2, 4, 16, 16), dtype=jnp.float32)
    out_small = jax.block_until_ready(eca_forward(x_small, conv_weight))
    np.testing.assert_allclose(
        np.asarray(out_small), np.asarray(eca_reference(x_small, conv_weight)),
        rtol=1e-5, atol=1e-5)

    # Case 2: lane-aligned channels (roll conv path) + padded spatial axis.
    x_wide = jax.random.normal(kx2, (2, 128, 8, 8), dtype=jnp.float32)
    out_wide = jax.block_until_ready(eca_forward(x_wide, conv_weight))
    np.testing.assert_allclose(
        np.asarray(out_wide), np.asarray(eca_reference(x_wide, conv_weight)),
        rtol=1e-5, atol=1e-5)

    print("KERNEL_OK")
</pallas_src>

<mosaic_0001>
module attributes {stable_mosaic.version = 11 : i64} {
  func.func @eca_kernel_band(%arg0: i32, %arg1: memref<4x4xf32, #tpu.memory_space<vmem>>, %arg2: memref<1x4x256xf32, #tpu.memory_space<vmem>>, %arg3: memref<1x4x256xf32, #tpu.memory_space<vmem>>) attributes {dimension_semantics = [#tpu.dimension_semantics<parallel>], iteration_bounds = array<i64: 2>, scalar_prefetch = 0 : i64, scratch_operands = 0 : i64, tpu.core_type = #tpu.core_type<tc>, window_params = [{pipeline_mode = #tpu.pipeline_mode<synchronous>, transform_indices = @transform_0, window_bounds = array<i64: 4, 4>}, {transform_indices = @transform_1, window_bounds = array<i64: 1, 4, 256>}, {transform_indices = @transform_2, window_bounds = array<i64: 1, 4, 256>}]} {
    %c0 = arith.constant 0 : index
    %c0_0 = arith.constant 0 : index
    %c0_1 = arith.constant 0 : index
    %0 = vector.load %arg2[%c0, %c0_0, %c0_1] : memref<1x4x256xf32, #tpu.memory_space<vmem>>, vector<1x4x256xf32>
    %cst = arith.constant dense<0.000000e+00> : vector<1x4xf32>
    %1 = vector.multi_reduction <add>, %0, %cst [2] : vector<1x4x256xf32> to vector<1x4xf32>
    %cst_2 = arith.constant 3.906250e-03 : f32
    %2 = vector.broadcast %cst_2 : f32 to vector<1x4xf32>
    %3 = arith.mulf %1, %2 : vector<1x4xf32>
    %c0_3 = arith.constant 0 : index
    %c0_4 = arith.constant 0 : index
    %4 = vector.load %arg1[%c0_3, %c0_4] : memref<4x4xf32, #tpu.memory_space<vmem>>, vector<4x4xf32>
    %cst_5 = arith.constant dense<0.000000e+00> : vector<1x4xf32>
    %5 = tpu.matmul %3, %4, %cst_5 {dimension_numbers = #tpu.dot_dimension_numbers<[1], [0], [0], [1], [0, 0, 1, 1], [], []>} : vector<1x4xf32>, vector<4x4xf32>, vector<1x4xf32> -> vector<1x4xf32>
    %6 = arith.negf %5 : vector<1x4xf32>
    %7 = math.exp %6 : vector<1x4xf32>
    %cst_6 = arith.constant 1.000000e+00 : f32
    %8 = vector.broadcast %cst_6 : f32 to vector<1x4xf32>
    %9 = arith.addf %8, %7 : vector<1x4xf32>
    %10 = arith.divf %8, %9 : vector<1x4xf32>
    %11 = arith.mulf %10, %10 : vector<1x4xf32>
    %12 = vector.shape_cast %11 : vector<1x4xf32> to vector<1x4x1xf32>
    %13 = vector.broadcast %12 : vector<1x4x1xf32> to vector<1x4x256xf32>
    %14 = arith.mulf %0, %13 : vector<1x4x256xf32>
    %c0_7 = arith.constant 0 : index
    %c0_8 = arith.constant 0 : index
    %c0_9 = arith.constant 0 : index
    %15 = vector.load %arg3[%c0_7, %c0_8, %c0_9] : memref<1x4x256xf32, #tpu.memory_space<vmem>>, vector<1x4x256xf32>
    tpu.vector_store %arg3[%c0_7, %c0_8, %c0_9], %14 {strides = array<i32>} : memref<1x4x256xf32, #tpu.memory_space<vmem>>, vector<1x4x256xf32>,
    return
  }
  func.func @transform_0(%arg0: i32) -> (i32, i32) {
    %c0_i32 = arith.constant 0 : i32
    %c0_i32_0 = arith.constant 0 : i32
    %c0_i32_1 = arith.constant 0 : i32
    return %c0_i32, %c0_i32_0 : i32, i32
  }
  func.func @transform_1(%arg0: i32) -> (i32, i32, i32) {
    %c0_i32 = arith.constant 0 : i32
    %c0_i32_0 = arith.constant 0 : i32
    %c0_i32_1 = arith.constant 0 : i32
    return %arg0, %c0_i32, %c0_i32_0 : i32, i32, i32
  }
  func.func @transform_2(%arg0: i32) -> (i32, i32, i32) {
    %c0_i32 = arith.constant 0 : i32
    %c0_i32_0 = arith.constant 0 : i32
    %c0_i32_1 = arith.constant 0 : i32
    return %arg0, %c0_i32, %c0_i32_0 : i32, i32, i32
  }
}

</mosaic_0001>

<bundles_post_ra>
// kernel: tpu_custom_call.1
= control target key start
LH: loop header
LB: loop body
LE: loop exit
PB: predicated region body
PF: predicated region fallthrough
CT: control target
= control target key end

     0   :  { %7 = vsyncpa [#allocation3], 0  ;;  %s798_s0 = inlined_call_operand.hbm [shape: f32[4,4], index: 0, kind: input, shape index: {}]   ;;  %s799_s1 = inlined_call_operand.hbm [shape: f32[2,4,256], index: 1, kind: input, shape index: {}]   ;;  %s800_s2 = inlined_call_operand.hbm [shape: f32[2,4,256], index: 2, kind: output, shape index: {}]  }
   0x1   :  { %8 = vsyncpa [#allocation6], 0 }
   0x2   :  { %10 = vsyncpa [#allocation6 + $0x1], 0 }
   0x3   :  { %11 = vsyncpa [#allocation4], 0 }
   0x4   :  { %13 = vsyncpa [#allocation4 + $0x1], 0  ;;  %s628_s9 = smov 0   ;;  %s630_s10 = smov 0  }
   0x5   :  { %s632_s11 = smov 0   ;;  %s634_s12 = smov 0  }
   0x6 LB: > { %s649_s13 = sadd.s32 4294967295, %s605_s12   ;;  %s390_s14 = sadd.s32 4294967294, %s605_s12   ;;  %s605_s12 = sphi %s634_s12, %s823_s12   ;;  %s601_s11 = sphi %s632_s11, %s822_s11   ;;  %s597_s10 = sphi %s630_s10, %s821_s10   ;;  %s593_s9 = sphi %s628_s9, %s820_s9  }
   0x7   : > { %p60_p0 = scmp.ne.s32.totalorder %s597_s10, %s593_s9  ;;  %p801_p1 = scmp.eq.s32.totalorder %s649_s13, 0 }
   0x8   : > { %p90_p3 = scmp.eq.s32.totalorder %s390_s14, 1  ;;  %p391_p5 = scmp.ge.s32.totalorder %s605_s12, 1 }
   0x9   : > { %p658_p4 = por %p801_p1, %p60_p0  ;;  %p97_p7 = scmp.lt.s32.totalorder %s605_s12, 3 }
   0xa   : > { %p663_p6 = por %p90_p3, %p60_p0  ;;  %s607_s18 = smov [#allocation2]  }
   0xb   : > { %s805_s15 = scalar_select %p658_p4, 1, 0 }
   0xc   : > { %s806_s16 = scalar_select %p663_p6, 1, 0 }
   0xd   : > { %p668_p8 = pnand %p391_p5, %p97_p7  ;;  %s110_s19 = sshll.u32 %s607_s18, 4  ;;  %s111_s19 = int_to_ptr.vmem [resolvable:$true] %s110_s19 }
   0xe   : > { %s676_s20 = sadd.s32 1, %s605_s12   ;;  %s47_s24 = sadd.s32 1, %s601_s11 }
   0xf   : > { %s807_s17 = scalar_select %p668_p8, 1, 0 }
  0x10   : > { %p426_p10 = pneg %p668_p8  ;;  %s44_s22 = ssub.s32 %s605_s12, %s676_s20 }
  0x11   : > { %p686_p12 = scmp.eq.s32.totalorder %s44_s22, 0  ;;  %p54_p13 = scmp.ne.s32.totalorder %s601_s11, %s597_s10 }
  0x12   : > { %p680_p11 = pnand %p426_p10, %p801_p1  ;;  %s494_s25 = scalar_lea.vmem %s111_s19, 64 }
  0x13   : > { %p495_p3 = scmp.ne.s32.totalorder %s111_s19, %s494_s25  ;;  %p502_p9 = scmp.lt.s32.totalorder %s111_s19, %s111_s19 }
  0x14   : > { %p485_p0 = pneg %p680_p11  ;;  %p503_p2 = scmp.lt.s32.totalorder %s494_s25, %s494_s25 }
  0x16   : > { %p497_p5 = pnand %p495_p3, %p485_p0  ;;  %p504_p10 = por %p503_p2, %p502_p9 }
  0x18   : > { %p498_p7 = pneg %p497_p5 }
  0x1a   : > { %p505_p1 = pnand %p504_p10, %p498_p7 }
  0x1c   : > { %508 = shalt.err (!%p505_p1)
}
  0x1d   : > { %429 = dma.hbm_to_vmem [thread:$0]  (!%p680_p11), %s798_s0, 64, %s111_s19, [#allocation3]  }
  0x1e   : > { %s703_s28 = scalar_select %p686_p12, %s601_s11, %s47_s24  }
  0x1f   : > { %p55_p1 = scmp.eq.s32.totalorder %s605_s12, 0  ;;  %p810_p2 = scmp.eq.s32.totalorder %s649_s13, 1 }
  0x20   : > { %p439_p0 = scmp.lt.s32.totalorder %s605_s12, 2  ;;  %s121_s30 = sand.u32 1, %s601_s11  }
  0x21   : > { %p711_p9 = por %p810_p2, %p54_p13  ;;  %p56_p3 = por %p55_p1, %p54_p13 }
  0x22   : > { %s394_s3 = sshll.u32 %s121_s30, 3  ;;  %s409_s4 = sshll.u32 %s605_s12, 7 }
  0x23   : > { %s811_s29 = scalar_select %p711_p9, 1, 0 }
  0x24   : > { %s724_s7 = scalar_lea.hbm %s799_s1, %s409_s4  ;;  %s125_s8 = scalar_lea.vmem [#allocation5], %s394_s3 }
  0x25   : > { %s133_s14 = sshll.u32 %s125_s8, 4  ;;  %p726_p11 = pnand %p439_p0, %p56_p3  ;;  %s134_s14 = int_to_ptr.vmem [resolvable:$true] %s133_s14 }
  0x26   : > { %s122_s19 = scalar_lea.sflag [#allocation6], %s121_s30  ;;  %s509_s21 = scalar_lea.hbm %s724_s7, 128 }
  0x27   : > { %p510_p12 = scmp.ne.s32.totalorder %s724_s7, %s509_s21  ;;  %p511_p13 = pneg %p726_p11 }
  0x28   : > { %s514_s24 = scalar_lea.hbm %s799_s1, 256  ;;  %p515_p10 = scmp.lt.s32.totalorder %s724_s7, %s799_s1 }
  0x29   : > { %p512_p5 = pnand %p511_p13, %p510_p12  ;;  %p516_p1 = scmp.lt.s32.totalorder %s514_s24, %s509_s21 }
  0x2b   : > { %p513_p7 = pneg %p512_p5  ;;  %p517_p2 = por %p516_p1, %p515_p10 }
  0x2d   : > { %p518_p0 = pnand %p517_p2, %p513_p7 }
  0x2f   : > { %521 = shalt.err (!%p518_p0)
}
  0x30   : > { %s522_s27 = scalar_lea.vmem %s134_s14, 128  ;;  %s608_s30 = smov [#allocation5]  }
  0x31   : > { %p523_p3 = scmp.ne.s32.totalorder %s134_s14, %s522_s27  ;;  %s527_s3 = sshll.u32 %s608_s30, 4  ;;  %s528_s3 = int_to_ptr.vmem [resolvable:$false] %s527_s3 }
  0x32   : > { %s529_s4 = scalar_lea.vmem %s528_s3, 256  ;;  %p530_p12 = scmp.lt.s32.totalorder %s134_s14, %s528_s3 }
  0x33   : > { %p525_p6 = pnand %p523_p3, %p511_p13  ;;  %p531_p5 = scmp.lt.s32.totalorder %s529_s4, %s522_s27 }
  0x35   : > { %p526_p9 = pneg %p525_p6  ;;  %p532_p4 = por %p531_p5, %p530_p12 }
  0x37   : > { %p533_p8 = pnand %p532_p4, %p526_p9 }
  0x39   : > { %536 = shalt.err (!%p533_p8)
}
  0x3a   : > { %433 = dma.hbm_to_vmem [thread:$0]  (!%p726_p11), %s724_s7, 128, %s134_s14, %s122_s19  }
  0x3b   : > { %p813_p7 = scmp.ne.s32.totalorder %s807_s17, 0 }
  0x3c   : > { %p814_p10 = scmp.eq.s32.totalorder (!%p813_p7), %s649_s13, 0 }
  0x3d   : > { %142 = sbr.rel (%p813_p7) target bundleno = 580 (0x244), region = 28 }
  0x42   : > { %580 = dma.done.wait (%p814_p10), [#allocation3], 64   ;;  %p815_p6 = pmov %p814_p10 }
  0x43   : > { %s751_s5 = sand.u32 1, %s597_s10   ;;  %p816_p4 = scmp.ne.s32.totalorder %s805_s15, 0 }
  0x44   : > { %582 = vsyncadd (%p815_p6), [#allocation3], 4294967232  ;;  %s399_s6 = sshll.u32 %s751_s5, 3  ;;  %s149_s8 = scalar_lea.sflag [#allocation6], %s751_s5 }
  0x45   : > { %s152_s7 = scalar_lea.vmem [#allocation5], %s399_s6 }
  0x46   : > { %584 = dma.done.wait (%p816_p4), %s149_s8, 128  }
  0x47   : > { %586 = vsyncadd (%p816_p4), %s149_s8, 4294967168  ;;  %vm177_vm0 = vcmask 1043456   ;;  %v173_v0 = vld [vmem:[%s152_s7] sm:$0xff]  ;;  %v609_v5 = vmov 0.0   ;;  %v184_v6 = vld [vmem:[#allocation2] sm:$0xf]  ;;  %v186_v7 = vlaneseq }
  0x48   : > { %v175_v1 = vcombine.high %v173_v0, %v173_v0  ;;  %v178_v2 = vsel %vm177_vm0, %v173_v0, 0.0  ;;  %413 = vmatprep.subr.mxu0 %v609_v5  ;;  %vm610_vm1 = vmmov 0   ;;  %vm192_vm2 = vcmask 31744   ;;  %s410_s15 = sshll.u32 %s649_s13, 7  ;;  %s172_s17 = scalar_lea.vmem [#allocation7], %s399_s6 }
  0x49   : > { %414 = vmatpush3.msk.msra.mxu0 %vm177_vm0, %v184_v6  ;;  %415 = vmatprep.mubr.msk.f32.mxu0 %vm610_vm1, %v609_v5  ;;  %v187_v8 = vand.u32 127, %v186_v7  ;;  %v189_v9 = vshrl.u32 %v186_v7, 7  ;;  %v611_v23 = vmov 839922192   ;;  %s308_s14 = sshll.u32 %s172_s17, 4  ;;  %s306_s21 = scalar_lea.hbm %s800_s2, %s410_s15  ;;  %s309_s14 = int_to_ptr.vmem [resolvable:$true] %s308_s14 }
  0x4a   : > { %v179_v3 = vsel %vm177_vm0, %v175_v1, 0.0  ;;  %v284_v24 = vunpack.c.l.s4 %v611_v23  ;;  %s294_s22 = scalar_lea.sflag [#allocation4], %s751_s5  ;;  %s537_s23 = scalar_lea.vmem %s309_s14, 128 }
  0x4b   : > { %v180_v4 = vadd.f32 %v179_v3, %v178_v2  ;;  %v190_v10 = vsub.s32 %v187_v8, %v189_v9  ;;  %v277_v19 = vsub.s32 0, %v189_v9  ;;  %p538_p8 = scmp.ne.s32.totalorder %s309_s14, %s537_s23  ;;  %p817_p9 = scmp.ne.s32.totalorder %s811_s29, 0 }
  0x4c   : > { %v285_v25 = vunpack.c.0.s8 %v284_v24  ;;  %s612_s24 = smov [#allocation7]  }
  0x4d   : > { %181 = vadd.xlane.f32.xlu0 %v180_v4  ;;  %p539_p11 = pnand %p538_p8, %p817_p9  ;;  %s541_s25 = sshll.u32 %s612_s24, 4  ;;  %s542_s25 = int_to_ptr.vmem [resolvable:$false] %s541_s25 }
  0x4e   : > { %v288_v26 = vsub.s32 %v285_v25, %v189_v9  ;;  %s543_s13 = scalar_lea.vmem %s542_s25, 256  ;;  %p544_p1 = scmp.lt.s32.totalorder %s309_s14, %s542_s25 }
  0x4f   : > { %p540_p13 = pneg %p539_p11  ;;  %p545_p2 = scmp.lt.s32.totalorder %s543_s13, %s537_s23 }
  0x51   : > { %p546_p0 = por %p545_p2, %p544_p1 }
  0x53   : > { %p547_p3 = pnand %p546_p0, %p540_p13 }
  0xd6   : > { %v182_v11 = vpop.xlane.xlu0 %181 }
  0xd7   : > { %v183_v12 = vmul.f32 0.00390625, %v182_v11 }
  0xd9   : > { %v191_v13 = vrot.slane %v183_v12, %v190_v10 }
  0xdb   : > { %416 = vmatmul.mubr.msk.f32.vlgmr.msra.gmra.mxu0 %vm192_vm2, %v191_v13 }
 0x19b   : > { %v264_v14 = vpop.f32.mrf.mxu0 }
 0x19c   : > { %v403_v15 = vmul.f32 -1.442695, %v264_v14 }
 0x19d   : > { %v417_v16 = vpop.f32.mrf.mxu0 }
 0x19e   : > { %479 = vpow2.f32 %v403_v15 }
 0x1ab   : > { %v480_v17 = vpop.eup %479 }
 0x1ac   : > { %v271_v18 = vadd.f32 1.0, %v480_v17 }
 0x1ae   : > { %481 = vrcp.f32 %v271_v18 }
 0x1bb   : > { %v482_v20 = vpop.eup %481 }
 0x1bc   : > { %v274_v21 = vmul.f32 %v482_v20, %v482_v20 }
 0x1be   : > { %v278_v22 = vrot.slane %v274_v21, %v277_v19 }
 0x1c0   : > { %280 = vbcast.lane.b32.xlu0 %v278_v22, 256 }
 0x232   : > { %v281_v27 = vpop.permute.xlu0 %280 }
 0x233   : > { %v289_v28 = vrot.slane %v281_v27, %v288_v26 }
 0x235   : > { %v291_v29 = vmul.f32 %v289_v28, %v173_v0 }
 0x237   : > { %292 = vst [vmem:[%s172_s17] sm:$0xff] %v291_v29 }
 0x238   : > { %550 = shalt.err (!%p547_p3)
}
 0x239   : > { %s551_s26 = scalar_lea.hbm %s306_s21, 128  ;;  %s555_s3 = scalar_lea.hbm %s800_s2, 256 }
 0x23a   : > { %p552_p12 = scmp.ne.s32.totalorder %s306_s21, %s551_s26  ;;  %p556_p10 = scmp.lt.s32.totalorder %s306_s21, %s800_s2 }
 0x23b   : > { %p557_p6 = scmp.lt.s32.totalorder %s555_s3, %s551_s26 }
 0x23c   : > { %p553_p5 = pnand %p552_p12, %p817_p9 }
 0x23d   : > { %p558_p4 = por %p557_p6, %p556_p10 }
 0x23e   : > { %p554_p7 = pneg %p553_p5 }
 0x240   : > { %p559_p8 = pnand %p558_p4, %p554_p7 }
 0x242   : > { %562 = shalt.err (!%p559_p8)
}
 0x243   : > { %424 = dma.vmem_to_hbm [thread:$0]  (%p817_p9), %s309_s14, 128, %s306_s21, %s294_s22  }
 0x244 PF: > { %s320_s6 = sand.u32 1, %s593_s9   ;;  %p818_p11 = scmp.ne.s32.totalorder %s806_s16, 0 }
 0x245   : > { %p819_p13 = scmp.ge.s32.totalorder %s605_s12, 2  ;;  %s321_s8 = scalar_lea.sflag [#allocation4], %s320_s6 }
 0x247   : > { %p435_p1 = pnand %p819_p13, %p818_p11 }
 0x249   : > { %p436_p2 = pneg %p435_p1 }
 0x24b   : > { %588 = dma.done.wait (%p436_p2), %s321_s8, 128  }
 0x24c   : > { %590 = vsyncadd (%p436_p2), %s321_s8, 4294967168  ;;  %p16_p0 = scmp.ge.s32.totalorder %s676_s20, 4   ;;  %s820_s9 = smov %s597_s10 }
 0x24d   : > { %s821_s10 = smov %s601_s11  ;;  %s822_s11 = smov %s703_s28 }
 0x24e   : > { %s823_s12 = smov %s676_s20  ;;  %18 = sbr.rel (!%p16_p0) target bundleno = 6 (0x6), region = 78 }
 0x253   :  { %326 = vsyncpa [#allocation3], 1 }
 0x254   :  { %328 = vsyncpa [#allocation3 + $0x1], 1 }
 0x255   :  { %329 = vsyncpa [#allocation6], 1 }
 0x256   :  { %331 = vsyncpa [#allocation6 + $0x1], 1 }
 0x257   :  { %332 = vsyncpa [#allocation4], 1 }
 0x258   :  { %334 = vsyncpa [#allocation4 + $0x1], 1 }

</bundles_post_ra>
